<compile_context>
chip_gen: v7x
topology: tpu7x:2x2x1
jax: 0.10.0
libtpu: 0.0.40
codegen_flags: <defaults>
</compile_context>

<pallas_src>
import functools

import jax
import jax.numpy as jnp
from jax.experimental import pallas as pl
from jax.experimental.pallas import tpu as pltpu


def _decomp_kernel(kernel_size, pad, x_ref, mean_ref, res_ref):
    """x_ref/mean_ref/res_ref: (Bt, L, C_tile) blocks."""
    Bt, L, Ct = x_ref.shape
    x = x_ref[...].astype(jnp.float32)                      # (Bt, L, Ct)

    if pad > 0:
        # In-kernel replication padding of the time axis.
        front = jnp.broadcast_to(x[:, 0:1, :], (Bt, pad, Ct))
        end = jnp.broadcast_to(x[:, L - 1:L, :], (Bt, pad, Ct))
        xp = jnp.concatenate([front, x, end], axis=1)        # (Bt, L + 2*pad, Ct)
    else:
        xp = x

    # Sliding-window sum over the k taps, accumulated in f32.
    # The center tap (j == pad) is x itself -> one fewer shifted slice.
    acc = x
    for j in range(kernel_size):
        if j == pad:
            continue
        acc = acc + xp[:, j:j + L, :]

    mean = acc * (1.0 / kernel_size)
    mean_ref[...] = mean.astype(mean_ref.dtype)
    res_ref[...] = (x - mean).astype(res_ref.dtype)


_TARGET_BLOCK_BYTES = 2 * 1024 * 1024   # per-array f32 block budget


def _choose_c_tile(L, C):
    """Largest lane-dense C tile whose (L, TC) f32 block stays under budget."""
    if C <= 128:
        return C                         # full (small) channel dim in one block
    tc = (_TARGET_BLOCK_BYTES // (L * 4)) // 128 * 128
    tc = max(128, tc)
    return C if tc >= C else tc


def _choose_b_tile(B, L, TC):
    """Largest divisor of B whose (Bt, L, TC) f32 block stays under budget."""
    for bt in range(B, 0, -1):
        if B % bt == 0 and bt * L * TC * 4 <= _TARGET_BLOCK_BYTES:
            return bt
    return 1


def series_decomp(x, kernel_size, c_block=None, b_block=None):
    """x: (B, L, C). Returns (res, moving_mean), both (B, L, C)."""
    assert kernel_size % 2 == 1, "kernel_size must be odd (as used in series_decomp)"
    B, L, C = x.shape
    pad = (kernel_size - 1) // 2
    itemsize = jnp.dtype(x.dtype).itemsize

    TC = _choose_c_tile(L, C) if c_block is None else c_block
    assert TC == C or TC % 128 == 0, "C tile must be full C or a multiple of 128"
    nC = pl.cdiv(C, TC)

    TB = _choose_b_tile(B, L, TC) if b_block is None else b_block
    assert B % TB == 0, "B tile must divide B"
    nB = B // TB

    kernel = functools.partial(_decomp_kernel, kernel_size, pad)
    block = (TB, L, TC)
    idx = lambda b, c: (b, 0, c)

    mean, res = pl.pallas_call(
        kernel,
        out_shape=(
            jax.ShapeDtypeStruct((B, L, C), x.dtype),   # moving_mean
            jax.ShapeDtypeStruct((B, L, C), x.dtype),   # res
        ),
        grid_spec=pltpu.PrefetchScalarGridSpec(
            num_scalar_prefetch=0,
            grid=(nB, nC),
            in_specs=[pl.BlockSpec(block, idx)],
            out_specs=[pl.BlockSpec(block, idx), pl.BlockSpec(block, idx)],
        ),
        compiler_params=pltpu.CompilerParams(
            dimension_semantics=("parallel", "parallel"),
            vmem_limit_bytes=32 * 1024 * 1024,
        ),
        cost_estimate=pl.CostEstimate(
            flops=(kernel_size + 1) * B * L * C,
            transcendentals=0,
            bytes_accessed=3 * B * L * C * itemsize,
        ),
    )(x)
    return res, mean


def _reference(x, kernel_size):
    """Pure-JAX reference mirroring the PyTorch module."""
    pad = (kernel_size - 1) // 2
    front = jnp.repeat(x[:, 0:1, :], pad, axis=1)
    end = jnp.repeat(x[:, -1:, :], pad, axis=1)
    xpad = jnp.concatenate([front, x, end], axis=1)
    L = x.shape[1]
    windows = jnp.stack([xpad[:, j:j + L, :] for j in range(kernel_size)], axis=0)
    mean = jnp.mean(windows, axis=0)
    return x - mean, mean


def _check(x, kernel_size, c_block=None, b_block=None):
    res, mean = series_decomp(x, kernel_size, c_block=c_block, b_block=b_block)
    jax.block_until_ready((res, mean))
    res_ref, mean_ref = _reference(x, kernel_size)
    assert mean.shape == x.shape and res.shape == x.shape
    assert jnp.allclose(mean, mean_ref, atol=1e-5, rtol=1e-5)
    assert jnp.allclose(res, res_ref, atol=1e-5, rtol=1e-5)


if __name__ == "__main__":
    key = jax.random.PRNGKey(0)
    k0, k1 = jax.random.split(key)

    # Small-C case (typical series_decomp: few channels); batch packed into
    # a single block, full C on lanes.
    x_small = jax.random.normal(k0, (2, 16, 8), dtype=jnp.float32)
    _check(x_small, kernel_size=5)
    _check(x_small, kernel_size=5, b_block=1)     # per-batch grid path

    # Larger-C case: lane-dense 128-multiple channel dim; also exercise the
    # multi-C-tile grid path explicitly.
    x_wide = jax.random.normal(k1, (2, 32, 256), dtype=jnp.float32)
    _check(x_wide, kernel_size=7)                 # single (full-C) block
    _check(x_wide, kernel_size=7, c_block=128)    # two 128-lane C tiles

    print("KERNEL_OK")
</pallas_src>

<mosaic_0001>
module attributes {stable_mosaic.version = 11 : i64} {
  func.func @_decomp_kernel(%arg0: i32, %arg1: i32, %arg2: memref<2x16x8xf32, #tpu.memory_space<vmem>>, %arg3: memref<2x16x8xf32, #tpu.memory_space<vmem>>, %arg4: memref<2x16x8xf32, #tpu.memory_space<vmem>>) attributes {dimension_semantics = [#tpu.dimension_semantics<parallel>, #tpu.dimension_semantics<parallel>], iteration_bounds = array<i64: 1, 1>, scalar_prefetch = 0 : i64, scratch_operands = 0 : i64, tpu.core_type = #tpu.core_type<tc>, window_params = [{transform_indices = @transform_0, window_bounds = array<i64: 2, 16, 8>}, {transform_indices = @transform_1, window_bounds = array<i64: 2, 16, 8>}, {transform_indices = @transform_2, window_bounds = array<i64: 2, 16, 8>}]} {
    %c0 = arith.constant 0 : index
    %c0_0 = arith.constant 0 : index
    %c0_1 = arith.constant 0 : index
    %0 = vector.load %arg2[%c0, %c0_0, %c0_1] : memref<2x16x8xf32, #tpu.memory_space<vmem>>, vector<2x16x8xf32>
    %1 = vector.extract_strided_slice %0 {offsets = [0, 0, 0], sizes = [2, 1, 8], strides = [1, 1, 1]} : vector<2x16x8xf32> to vector<2x1x8xf32>
    %2 = vector.shape_cast %1 : vector<2x1x8xf32> to vector<2x1x8xf32>
    %3 = vector.broadcast %2 : vector<2x1x8xf32> to vector<2x2x8xf32>
    %4 = vector.extract_strided_slice %0 {offsets = [0, 15, 0], sizes = [2, 1, 8], strides = [1, 1, 1]} : vector<2x16x8xf32> to vector<2x1x8xf32>
    %5 = vector.shape_cast %4 : vector<2x1x8xf32> to vector<2x1x8xf32>
    %6 = vector.broadcast %5 : vector<2x1x8xf32> to vector<2x2x8xf32>
    %7 = tpu.concatenate %3, %0, %6 in 1 : vector<2x2x8xf32>, vector<2x16x8xf32>, vector<2x2x8xf32> -> vector<2x20x8xf32>
    %8 = vector.extract_strided_slice %7 {offsets = [0, 0, 0], sizes = [2, 16, 8], strides = [1, 1, 1]} : vector<2x20x8xf32> to vector<2x16x8xf32>
    %9 = arith.addf %0, %8 : vector<2x16x8xf32>
    %10 = vector.extract_strided_slice %7 {offsets = [0, 1, 0], sizes = [2, 16, 8], strides = [1, 1, 1]} : vector<2x20x8xf32> to vector<2x16x8xf32>
    %11 = arith.addf %9, %10 : vector<2x16x8xf32>
    %12 = vector.extract_strided_slice %7 {offsets = [0, 3, 0], sizes = [2, 16, 8], strides = [1, 1, 1]} : vector<2x20x8xf32> to vector<2x16x8xf32>
    %13 = arith.addf %11, %12 : vector<2x16x8xf32>
    %14 = vector.extract_strided_slice %7 {offsets = [0, 4, 0], sizes = [2, 16, 8], strides = [1, 1, 1]} : vector<2x20x8xf32> to vector<2x16x8xf32>
    %15 = arith.addf %13, %14 : vector<2x16x8xf32>
    %cst = arith.constant 2.000000e-01 : f32
    %16 = vector.broadcast %cst : f32 to vector<2x16x8xf32>
    %17 = arith.mulf %15, %16 : vector<2x16x8xf32>
    %c0_2 = arith.constant 0 : index
    %c0_3 = arith.constant 0 : index
    %c0_4 = arith.constant 0 : index
    %18 = vector.load %arg3[%c0_2, %c0_3, %c0_4] : memref<2x16x8xf32, #tpu.memory_space<vmem>>, vector<2x16x8xf32>
    tpu.vector_store %arg3[%c0_2, %c0_3, %c0_4], %17 {strides = array<i32>} : memref<2x16x8xf32, #tpu.memory_space<vmem>>, vector<2x16x8xf32>,
    %19 = arith.subf %0, %17 : vector<2x16x8xf32>
    %c0_5 = arith.constant 0 : index
    %c0_6 = arith.constant 0 : index
    %c0_7 = arith.constant 0 : index
    %20 = vector.load %arg4[%c0_5, %c0_6, %c0_7] : memref<2x16x8xf32, #tpu.memory_space<vmem>>, vector<2x16x8xf32>
    tpu.vector_store %arg4[%c0_5, %c0_6, %c0_7], %19 {strides = array<i32>} : memref<2x16x8xf32, #tpu.memory_space<vmem>>, vector<2x16x8xf32>,
    return
  }
  func.func @transform_0(%arg0: i32, %arg1: i32) -> (i32, i32, i32) {
    %c0_i32 = arith.constant 0 : i32
    %c0_i32_0 = arith.constant 0 : i32
    return %arg0, %c0_i32, %arg1 : i32, i32, i32
  }
  func.func @transform_1(%arg0: i32, %arg1: i32) -> (i32, i32, i32) {
    %c0_i32 = arith.constant 0 : i32
    %c0_i32_0 = arith.constant 0 : i32
    return %arg0, %c0_i32, %arg1 : i32, i32, i32
  }
  func.func @transform_2(%arg0: i32, %arg1: i32) -> (i32, i32, i32) {
    %c0_i32 = arith.constant 0 : i32
    %c0_i32_0 = arith.constant 0 : i32
    return %arg0, %c0_i32, %arg1 : i32, i32, i32
  }
}

</mosaic_0001>

<bundles_post_ra>
// kernel: tpu_custom_call.1
= control target key start
LH: loop header
LB: loop body
LE: loop exit
PB: predicated region body
PF: predicated region fallthrough
CT: control target
= control target key end

     0   :  { %v14_v0 = vlaneseq  ;;  %vm34_vm0 = vcmask 1041408   ;;  %vm59_vm1 = vcmask 1046528   ;;  %vm78_vm2 = vcmask 1044480   ;;  %s242_s0 = inlined_call_operand.vmem [shape: f32[2,16,8], index: 0, kind: input, shape index: {}]   ;;  %s243_s1 = inlined_call_operand.vmem [shape: f32[2,16,8], index: 1, kind: output, shape index: {0}]   ;;  %s244_s2 = inlined_call_operand.vmem [shape: f32[2,16,8], index: 2, kind: output, shape index: {1}]  }
   0x1   :  { %v159_v1 = vld [vmem:[%s242_s0] sm:$0xff]  ;;  %v164_v2 = vld [vmem:[%s242_s0 + $0x8] sm:$0xff]  ;;  %v169_v3 = vld [vmem:[%s242_s0 + $0x10] sm:$0xff]  ;;  %vm97_vm3 = vcmask 1043456   ;;  %vm120_vm4 = vcmask 64512  }
   0x2   :  { %v15_v4 = vshrl.u32 %v14_v0, 7  ;;  %v35_v5 = vrot.slane %v159_v1, 6  ;;  %v36_v6 = vrot.slane %v164_v2, 6  ;;  %v176_v7 = vld [vmem:[%s242_s0 + $0x18] sm:$0xff]  ;;  %v38_v8 = vrot.slane %v169_v3, 6 }
   0x3   :  { %v39_v9 = vrot.slane %v176_v7, 6 }
   0x4   :  { %v16_v10 = vsub.s32 0, %v15_v4  ;;  %v37_v11 = vsel %vm34_vm0, %v35_v5, %v36_v6  ;;  %v24_v12 = vsub.s32 7, %v15_v4 }
   0x5   :  { %v61_v13 = vrot.slane %v37_v11, 1  ;;  %v80_v14 = vrot.slane %v37_v11, 3  ;;  %v99_v15 = vrot.slane %v37_v11, 4  ;;  %v40_v19 = vsel %vm34_vm0, %v38_v8, %v39_v9 }
   0x6   :  { %v17_v16 = vrot.slane %v159_v1, %v16_v10  ;;  %v25_v17 = vrot.slane %v164_v2, %v24_v12  ;;  %v21_v18 = vrot.slane %v169_v3, %v16_v10  ;;  %v52_v20 = vadd.f32 %v37_v11, %v164_v2 }
   0x7   :  { %v66_v21 = vrot.slane %v40_v19, 1  ;;  %v85_v22 = vrot.slane %v40_v19, 3  ;;  %v104_v23 = vrot.slane %v40_v19, 4  ;;  %v29_v27 = vrot.slane %v176_v7, %v24_v12 }
   0x8   :  { %v47_v24 = vsel %vm34_vm0, %v17_v16, %v35_v5  ;;  %v49_v25 = vsel %vm34_vm0, %v36_v6, %v25_v17  ;;  %v48_v26 = vsel %vm34_vm0, %v21_v18, %v38_v8  ;;  %v54_v39 = vadd.f32 %v40_v19, %v176_v7 }
   0x9   :  { %v51_v28 = vadd.f32 %v47_v24, %v159_v1  ;;  %v60_v29 = vrot.slane %v47_v24, 1  ;;  %v79_v30 = vrot.slane %v47_v24, 3  ;;  %v98_v31 = vrot.slane %v47_v24, 4 }
   0xa   :  { %v63_v32 = vrot.slane %v49_v25, 1  ;;  %v82_v33 = vrot.slane %v49_v25, 3  ;;  %v101_v34 = vrot.slane %v49_v25, 4  ;;  %v53_v35 = vadd.f32 %v48_v26, %v169_v3 }
   0xb   :  { %v62_v36 = vsel %vm59_vm1, %v60_v29, %v61_v13  ;;  %v81_v37 = vsel %vm78_vm2, %v79_v30, %v80_v14  ;;  %v65_v38 = vrot.slane %v48_v26, 1  ;;  %v100_v41 = vsel %vm97_vm3, %v98_v31, %v99_v15 }
   0xc   :  { %v74_v40 = vadd.f32 %v62_v36, %v51_v28  ;;  %v64_v42 = vsel %vm59_vm1, %v61_v13, %v63_v32  ;;  %v83_v43 = vsel %vm78_vm2, %v80_v14, %v82_v33  ;;  %v84_v46 = vrot.slane %v48_v26, 3 }
   0xd   :  { %v75_v44 = vadd.f32 %v64_v42, %v52_v20  ;;  %v67_v45 = vsel %vm59_vm1, %v65_v38, %v66_v21  ;;  %v103_v47 = vrot.slane %v48_v26, 4  ;;  %v102_v49 = vsel %vm97_vm3, %v99_v15, %v101_v34 }
   0xe   :  { %v93_v48 = vadd.f32 %v81_v37, %v74_v40  ;;  %v76_v50 = vadd.f32 %v67_v45, %v53_v35  ;;  %v50_v51 = vsel %vm34_vm0, %v39_v9, %v29_v27  ;;  %v86_v53 = vsel %vm78_vm2, %v84_v46, %v85_v22 }
   0xf   :  { %v94_v52 = vadd.f32 %v83_v43, %v75_v44  ;;  %v105_v54 = vsel %vm97_vm3, %v103_v47, %v104_v23  ;;  %v68_v55 = vrot.slane %v50_v51, 1  ;;  %v87_v58 = vrot.slane %v50_v51, 3 }
  0x10   :  { %v112_v56 = vadd.f32 %v100_v41, %v93_v48  ;;  %v95_v57 = vadd.f32 %v86_v53, %v76_v50  ;;  %v106_v59 = vrot.slane %v50_v51, 4 }
  0x11   :  { %v113_v60 = vadd.f32 %v102_v49, %v94_v52  ;;  %v69_v61 = vsel %vm59_vm1, %v66_v21, %v68_v55  ;;  %v88_v4 = vsel %vm78_vm2, %v85_v22, %v87_v58 }
  0x12   :  { %v116_v62 = vmul.f32 0.2, %v112_v56  ;;  %v114_v63 = vadd.f32 %v105_v54, %v95_v57  ;;  %v77_v0 = vadd.f32 %v69_v61, %v54_v39  ;;  %v107_v6 = vsel %vm97_vm3, %v104_v23, %v106_v59 }
  0x13   :  { %v117_v5 = vmul.f32 0.2, %v113_v60 }
  0x14   :  { %121 = vst.msk [vmem:[%s243_s1] sm:$0xff] %vm120_vm4, %v116_v62  ;;  %v118_v8 = vmul.f32 0.2, %v114_v63  ;;  %v96_v9 = vadd.f32 %v88_v4, %v77_v0  ;;  %v125_v10 = vsub.f32 %v159_v1, %v116_v62 }
  0x15   :  { %122 = vst.msk [vmem:[%s243_s1 + $0x8] sm:$0xff] %vm120_vm4, %v117_v5  ;;  %v126_v11 = vsub.f32 %v164_v2, %v117_v5 }
  0x16   :  { %123 = vst.msk [vmem:[%s243_s1 + $0x10] sm:$0xff] %vm120_vm4, %v118_v8  ;;  %v115_v12 = vadd.f32 %v107_v6, %v96_v9  ;;  %129 = vst.msk [vmem:[%s244_s2] sm:$0xff] %vm120_vm4, %v125_v10  ;;  %v127_v1 = vsub.f32 %v169_v3, %v118_v8 }
  0x17   :  { %130 = vst.msk [vmem:[%s244_s2 + $0x8] sm:$0xff] %vm120_vm4, %v126_v11 }
  0x18   :  { %v119_v13 = vmul.f32 0.2, %v115_v12  ;;  %131 = vst.msk [vmem:[%s244_s2 + $0x10] sm:$0xff] %vm120_vm4, %v127_v1 }
  0x1a   :  { %124 = vst.msk [vmem:[%s243_s1 + $0x18] sm:$0xff] %vm120_vm4, %v119_v13  ;;  %v128_v2 = vsub.f32 %v176_v7, %v119_v13 }
  0x1c   :  { %132 = vst.msk [vmem:[%s244_s2 + $0x18] sm:$0xff] %vm120_vm4, %v128_v2 }

</bundles_post_ra>
